<compile_context>
chip_gen: v7x
topology: tpu7x:2x2x1
jax: 0.10.0
libtpu: 0.0.40
codegen_flags: <defaults>
</compile_context>

<pallas_src>
import functools
import math

import jax
import jax.numpy as jnp
from jax.experimental import pallas as pl
from jax.experimental.pallas import tpu as pltpu


def _round_up(x: int, m: int) -> int:
    return ((x + m - 1) // m) * m


def _mish(y):
    # Mish(y) = y * tanh(softplus(y)).
    # tanh(log1p(e^y)) == ((1+e^y)^2 - 1) / ((1+e^y)^2 + 1)  -> one exp + one div.
    e = jnp.exp(y)
    n = 1.0 + e
    n2 = n * n
    t = (n2 - 1.0) / (n2 + 1.0)
    # For large y, exp/n2 overflow; softplus(y) ~= y and tanh(y) ~= 1 there
    # (same threshold PyTorch uses for softplus).
    return jnp.where(y > 20.0, y, y * t)


def _mlp_fused_kernel(*refs, num_layers: int):
    # refs = (x_ref, w0, b0, w1, b1, ..., o_ref)
    x_ref = refs[0]
    o_ref = refs[-1]
    layer_refs = refs[1:-1]

    h = x_ref[...]
    for i in range(num_layers):
        w = layer_refs[2 * i][...]
        b = layer_refs[2 * i + 1][...]
        # MXU matmul; bias + activation epilogue kept in f32 (v5e VPU/EUP have no bf16).
        y = jnp.dot(h.astype(w.dtype), w, preferred_element_type=jnp.float32)
        y = y + b.astype(jnp.float32)
        if i < num_layers - 1:
            y = _mish(y)
        h = y
    o_ref[...] = h.astype(o_ref.dtype)


def mlp_forward(x, params, *, tm: int | None = None, pad_dim: int = 128,
                matmul_dtype=jnp.float32):
    """Fused MLP forward: Linear -> Mish for all but the last layer.

    x: (B, D0) float32; params: list of (W, b) with W stored as (D_in, D_out)
    (transpose of PyTorch's (out, in)) and b as (D_out,).
    """
    B, D0 = x.shape
    n_layers = len(params)
    dims = [D0] + [w.shape[1] for (w, _) in params]

    # ---- pad feature dims to lane-friendly multiples of 128 (zero padding is
    # exact: padded W rows/cols and biases are 0, and Mish(0) == 0).
    pdims = [_round_up(d, pad_dim) for d in dims]

    padded_args = []
    for i, (w, b) in enumerate(params):
        wp = jnp.zeros((pdims[i], pdims[i + 1]), matmul_dtype)
        wp = wp.at[: w.shape[0], : w.shape[1]].set(w.astype(matmul_dtype))
        bp = jnp.zeros((1, pdims[i + 1]), jnp.float32)
        bp = bp.at[0, : b.shape[0]].set(b.astype(jnp.float32))
        padded_args += [wp, bp]

    # ---- batch tiling: multiple-of-8 sublanes, capped at 256 rows; try to get
    # >=2 grid steps so v7x's second TensorCore participates.
    if tm is None:
        if B >= 16:
            tm = min(256, _round_up(max(B // 2, 1), 8))
        else:
            tm = _round_up(B, 8)
    tm = _round_up(tm, 8)
    B_pad = _round_up(B, tm)

    xp = jnp.zeros((B_pad, pdims[0]), x.dtype).at[:B, :D0].set(x)

    # ---- BlockSpecs: x/out tiled over batch, weights/biases full-block resident.
    in_specs = [pl.BlockSpec((tm, pdims[0]), lambda i: (i, 0))]
    for li in range(n_layers):
        in_specs.append(pl.BlockSpec((pdims[li], pdims[li + 1]), lambda i: (0, 0)))
        in_specs.append(pl.BlockSpec((1, pdims[li + 1]), lambda i: (0, 0)))
    out_spec = pl.BlockSpec((tm, pdims[-1]), lambda i: (i, 0))

    # ---- explicit VMEM budget (double-buffered I/O blocks + resident params +
    # intermediate activation slabs), capped under v7x's 64 MiB physical VMEM.
    act_itemsize = jnp.dtype(x.dtype).itemsize
    w_itemsize = jnp.dtype(matmul_dtype).itemsize
    param_bytes = sum(pdims[i] * pdims[i + 1] * w_itemsize + pdims[i + 1] * 4
                      for i in range(n_layers))
    io_bytes = (tm * pdims[0] + tm * pdims[-1]) * act_itemsize
    interm_bytes = tm * max(pdims) * 4 * 2
    vmem_limit = int(min(64 << 20,
                         max(4 << 20, 2 * (2 * io_bytes + 2 * param_bytes + interm_bytes))))

    kernel = functools.partial(_mlp_fused_kernel, num_layers=n_layers)
    out_padded = pl.pallas_call(
        kernel,
        out_shape=jax.ShapeDtypeStruct((B_pad, pdims[-1]), x.dtype),
        grid_spec=pltpu.PrefetchScalarGridSpec(
            num_scalar_prefetch=0,
            grid=(B_pad // tm,),
            in_specs=in_specs,
            out_specs=out_spec,
        ),
        compiler_params=pltpu.CompilerParams(
            dimension_semantics=("parallel",),
            vmem_limit_bytes=vmem_limit,
        ),
    )(xp, *padded_args)

    return out_padded[:B, : dims[-1]]


def init_mlp_params(dims, key):
    """Deterministic init matching nn.Linear default (uniform +/- 1/sqrt(fan_in))."""
    params = []
    for i in range(len(dims) - 1):
        key, kw, kb = jax.random.split(key, 3)
        fan_in, fan_out = dims[i], dims[i + 1]
        bound = 1.0 / math.sqrt(fan_in)
        # stored as (D_in, D_out) == PyTorch weight.T
        w = jax.random.uniform(kw, (fan_in, fan_out), jnp.float32, -bound, bound)
        b = jax.random.uniform(kb, (fan_out,), jnp.float32, -bound, bound)
        params.append((w, b))
    return params


def mlp_reference(x, params):
    """Pure-JAX reference (true Mish via softplus/tanh) for a sanity check."""
    n = len(params)
    for i, (w, b) in enumerate(params):
        x = x @ w + b
        if i < n - 1:
            x = x * jnp.tanh(jax.nn.softplus(x))
    return x


if __name__ == "__main__":
    key = jax.random.PRNGKey(0)
    kx, kp = jax.random.split(key)

    dims = [16, 32, 32, 8]   # MLP(dims=[16, 32, 32, 8])
    batch = 16               # tm=8 below -> 2 grid steps (exercises batch tiling)
    x = jax.random.normal(kx, (batch, dims[0]), jnp.float32)
    params = init_mlp_params(dims, kp)

    out = mlp_forward(x, params, tm=8)
    out = jax.block_until_ready(out)

    ref = mlp_reference(x, params)
    assert out.shape == (batch, dims[-1])
    assert jnp.allclose(out, ref, atol=1e-4, rtol=1e-4), "mismatch vs reference"

    print("KERNEL_OK")
</pallas_src>

<mosaic_0001>
module attributes {stable_mosaic.version = 11 : i64} {
  func.func @_mlp_fused_kernel(%arg0: i32, %arg1: memref<8x128xf32, #tpu.memory_space<vmem>>, %arg2: memref<128x128xf32, #tpu.memory_space<vmem>>, %arg3: memref<1x128xf32, #tpu.memory_space<vmem>>, %arg4: memref<128x128xf32, #tpu.memory_space<vmem>>, %arg5: memref<1x128xf32, #tpu.memory_space<vmem>>, %arg6: memref<128x128xf32, #tpu.memory_space<vmem>>, %arg7: memref<1x128xf32, #tpu.memory_space<vmem>>, %arg8: memref<8x128xf32, #tpu.memory_space<vmem>>) attributes {dimension_semantics = [#tpu.dimension_semantics<parallel>], iteration_bounds = array<i64: 2>, scalar_prefetch = 0 : i64, scratch_operands = 0 : i64, tpu.core_type = #tpu.core_type<tc>, window_params = [{transform_indices = @transform_0, window_bounds = array<i64: 8, 128>}, {pipeline_mode = #tpu.pipeline_mode<synchronous>, transform_indices = @transform_1, window_bounds = array<i64: 128, 128>}, {pipeline_mode = #tpu.pipeline_mode<synchronous>, transform_indices = @transform_2, window_bounds = array<i64: 1, 128>}, {pipeline_mode = #tpu.pipeline_mode<synchronous>, transform_indices = @transform_3, window_bounds = array<i64: 128, 128>}, {pipeline_mode = #tpu.pipeline_mode<synchronous>, transform_indices = @transform_4, window_bounds = array<i64: 1, 128>}, {pipeline_mode = #tpu.pipeline_mode<synchronous>, transform_indices = @transform_5, window_bounds = array<i64: 128, 128>}, {pipeline_mode = #tpu.pipeline_mode<synchronous>, transform_indices = @transform_6, window_bounds = array<i64: 1, 128>}, {transform_indices = @transform_7, window_bounds = array<i64: 8, 128>}]} {
    %c0 = arith.constant 0 : index
    %c0_0 = arith.constant 0 : index
    %0 = vector.load %arg1[%c0, %c0_0] : memref<8x128xf32, #tpu.memory_space<vmem>>, vector<8x128xf32>
    %c0_1 = arith.constant 0 : index
    %c0_2 = arith.constant 0 : index
    %1 = vector.load %arg2[%c0_1, %c0_2] : memref<128x128xf32, #tpu.memory_space<vmem>>, vector<128x128xf32>
    %c0_3 = arith.constant 0 : index
    %c0_4 = arith.constant 0 : index
    %2 = vector.load %arg3[%c0_3, %c0_4] : memref<1x128xf32, #tpu.memory_space<vmem>>, vector<1x128xf32>
    %cst = arith.constant dense<0.000000e+00> : vector<8x128xf32>
    %3 = tpu.matmul %0, %1, %cst {dimension_numbers = #tpu.dot_dimension_numbers<[1], [0], [0], [1], [0, 0, 1, 1], [], []>} : vector<8x128xf32>, vector<128x128xf32>, vector<8x128xf32> -> vector<8x128xf32>
    %4 = vector.broadcast %2 : vector<1x128xf32> to vector<8x128xf32>
    %5 = arith.addf %3, %4 : vector<8x128xf32>
    %6 = math.exp %5 : vector<8x128xf32>
    %cst_5 = arith.constant 1.000000e+00 : f32
    %7 = vector.broadcast %cst_5 : f32 to vector<8x128xf32>
    %8 = arith.addf %7, %6 : vector<8x128xf32>
    %9 = arith.mulf %8, %8 : vector<8x128xf32>
    %cst_6 = arith.constant 1.000000e+00 : f32
    %10 = vector.broadcast %cst_6 : f32 to vector<8x128xf32>
    %11 = arith.subf %9, %10 : vector<8x128xf32>
    %cst_7 = arith.constant 1.000000e+00 : f32
    %12 = vector.broadcast %cst_7 : f32 to vector<8x128xf32>
    %13 = arith.addf %9, %12 : vector<8x128xf32>
    %14 = arith.divf %11, %13 : vector<8x128xf32>
    %cst_8 = arith.constant 2.000000e+01 : f32
    %15 = vector.broadcast %cst_8 : f32 to vector<8x128xf32>
    %16 = arith.cmpf ogt, %5, %15 : vector<8x128xf32>
    %17 = arith.mulf %5, %14 : vector<8x128xf32>
    %18 = arith.select %16, %5, %17 : vector<8x128xi1>, vector<8x128xf32>
    %c0_9 = arith.constant 0 : index
    %c0_10 = arith.constant 0 : index
    %19 = vector.load %arg4[%c0_9, %c0_10] : memref<128x128xf32, #tpu.memory_space<vmem>>, vector<128x128xf32>
    %c0_11 = arith.constant 0 : index
    %c0_12 = arith.constant 0 : index
    %20 = vector.load %arg5[%c0_11, %c0_12] : memref<1x128xf32, #tpu.memory_space<vmem>>, vector<1x128xf32>
    %cst_13 = arith.constant dense<0.000000e+00> : vector<8x128xf32>
    %21 = tpu.matmul %18, %19, %cst_13 {dimension_numbers = #tpu.dot_dimension_numbers<[1], [0], [0], [1], [0, 0, 1, 1], [], []>} : vector<8x128xf32>, vector<128x128xf32>, vector<8x128xf32> -> vector<8x128xf32>
    %22 = vector.broadcast %20 : vector<1x128xf32> to vector<8x128xf32>
    %23 = arith.addf %21, %22 : vector<8x128xf32>
    %24 = math.exp %23 : vector<8x128xf32>
    %cst_14 = arith.constant 1.000000e+00 : f32
    %25 = vector.broadcast %cst_14 : f32 to vector<8x128xf32>
    %26 = arith.addf %25, %24 : vector<8x128xf32>
    %27 = arith.mulf %26, %26 : vector<8x128xf32>
    %cst_15 = arith.constant 1.000000e+00 : f32
    %28 = vector.broadcast %cst_15 : f32 to vector<8x128xf32>
    %29 = arith.subf %27, %28 : vector<8x128xf32>
    %cst_16 = arith.constant 1.000000e+00 : f32
    %30 = vector.broadcast %cst_16 : f32 to vector<8x128xf32>
    %31 = arith.addf %27, %30 : vector<8x128xf32>
    %32 = arith.divf %29, %31 : vector<8x128xf32>
    %cst_17 = arith.constant 2.000000e+01 : f32
    %33 = vector.broadcast %cst_17 : f32 to vector<8x128xf32>
    %34 = arith.cmpf ogt, %23, %33 : vector<8x128xf32>
    %35 = arith.mulf %23, %32 : vector<8x128xf32>
    %36 = arith.select %34, %23, %35 : vector<8x128xi1>, vector<8x128xf32>
    %c0_18 = arith.constant 0 : index
    %c0_19 = arith.constant 0 : index
    %37 = vector.load %arg6[%c0_18, %c0_19] : memref<128x128xf32, #tpu.memory_space<vmem>>, vector<128x128xf32>
    %c0_20 = arith.constant 0 : index
    %c0_21 = arith.constant 0 : index
    %38 = vector.load %arg7[%c0_20, %c0_21] : memref<1x128xf32, #tpu.memory_space<vmem>>, vector<1x128xf32>
    %cst_22 = arith.constant dense<0.000000e+00> : vector<8x128xf32>
    %39 = tpu.matmul %36, %37, %cst_22 {dimension_numbers = #tpu.dot_dimension_numbers<[1], [0], [0], [1], [0, 0, 1, 1], [], []>} : vector<8x128xf32>, vector<128x128xf32>, vector<8x128xf32> -> vector<8x128xf32>
    %40 = vector.broadcast %38 : vector<1x128xf32> to vector<8x128xf32>
    %41 = arith.addf %39, %40 : vector<8x128xf32>
    %c0_23 = arith.constant 0 : index
    %c0_24 = arith.constant 0 : index
    %42 = vector.load %arg8[%c0_23, %c0_24] : memref<8x128xf32, #tpu.memory_space<vmem>>, vector<8x128xf32>
    tpu.vector_store %arg8[%c0_23, %c0_24], %41 {strides = array<i32>} : memref<8x128xf32, #tpu.memory_space<vmem>>, vector<8x128xf32>,
    return
  }
  func.func @transform_0(%arg0: i32) -> (i32, i32) {
    %c0_i32 = arith.constant 0 : i32
    %c0_i32_0 = arith.constant 0 : i32
    return %arg0, %c0_i32 : i32, i32
  }
  func.func @transform_1(%arg0: i32) -> (i32, i32) {
    %c0_i32 = arith.constant 0 : i32
    %c0_i32_0 = arith.constant 0 : i32
    %c0_i32_1 = arith.constant 0 : i32
    return %c0_i32, %c0_i32_0 : i32, i32
  }
  func.func @transform_2(%arg0: i32) -> (i32, i32) {
    %c0_i32 = arith.constant 0 : i32
    %c0_i32_0 = arith.constant 0 : i32
    %c0_i32_1 = arith.constant 0 : i32
    return %c0_i32, %c0_i32_0 : i32, i32
  }
  func.func @transform_3(%arg0: i32) -> (i32, i32) {
    %c0_i32 = arith.constant 0 : i32
    %c0_i32_0 = arith.constant 0 : i32
    %c0_i32_1 = arith.constant 0 : i32
    return %c0_i32, %c0_i32_0 : i32, i32
  }
  func.func @transform_4(%arg0: i32) -> (i32, i32) {
    %c0_i32 = arith.constant 0 : i32
    %c0_i32_0 = arith.constant 0 : i32
    %c0_i32_1 = arith.constant 0 : i32
    return %c0_i32, %c0_i32_0 : i32, i32
  }
  func.func @transform_5(%arg0: i32) -> (i32, i32) {
    %c0_i32 = arith.constant 0 : i32
    %c0_i32_0 = arith.constant 0 : i32
    %c0_i32_1 = arith.constant 0 : i32
    return %c0_i32, %c0_i32_0 : i32, i32
  }
  func.func @transform_6(%arg0: i32) -> (i32, i32) {
    %c0_i32 = arith.constant 0 : i32
    %c0_i32_0 = arith.constant 0 : i32
    %c0_i32_1 = arith.constant 0 : i32
    return %c0_i32, %c0_i32_0 : i32, i32
  }
  func.func @transform_7(%arg0: i32) -> (i32, i32) {
    %c0_i32 = arith.constant 0 : i32
    %c0_i32_0 = arith.constant 0 : i32
    return %arg0, %c0_i32 : i32, i32
  }
}

</mosaic_0001>

<bundles_post_ra>
// kernel: tpu_custom_call.1
= control target key start
LH: loop header
LB: loop body
LE: loop exit
PB: predicated region body
PF: predicated region fallthrough
CT: control target
= control target key end

     0   :  { %12 = vsyncpa [#allocation3], 0  ;;  %s1641_s0 = inlined_call_operand.hbm [shape: f32[16,128], index: 0, kind: input, shape index: {}]   ;;  %s1642_s1 = inlined_call_operand.hbm [shape: f32[128,128], index: 1, kind: input, shape index: {}]   ;;  %s1643_s2 = inlined_call_operand.vmem [shape: f32[1,128], index: 2, kind: input, shape index: {}]   ;;  %s1644_s3 = inlined_call_operand.hbm [shape: f32[128,128], index: 3, kind: input, shape index: {}]   ;;  %s1645_s4 = inlined_call_operand.vmem [shape: f32[1,128], index: 4, kind: input, shape index: {}]   ;;  %s1646_s5 = inlined_call_operand.hbm [shape: f32[128,128], index: 5, kind: input, shape index: {}]   ;;  %s1647_s6 = inlined_call_operand.vmem [shape: f32[1,128], index: 6, kind: input, shape index: {}]   ;;  %s1648_s7 = inlined_call_operand.hbm [shape: f32[16,128], index: 7, kind: output, shape index: {}]  }
   0x1   :  { %14 = vsyncpa [#allocation3 + $0x1], 0 }
   0x2   :  { %15 = vsyncpa [#allocation6], 0 }
   0x3   :  { %16 = vsyncpa [#allocation9], 0 }
   0x4   :  { %17 = vsyncpa [#allocation4], 0 }
   0x5   :  { %19 = vsyncpa [#allocation4 + $0x1], 0  ;;  %s1335_s24 = smov 0   ;;  %s1337_s25 = smov 0  }
   0x6   :  { %s1339_s26 = smov 0   ;;  %s1341_s27 = smov 0  }
   0x7 LB: > { %s1356_s28 = sadd.s32 4294967295, %s1283_s27   ;;  %s754_s29 = sadd.s32 4294967294, %s1283_s27   ;;  %s1283_s27 = sphi %s1341_s27, %s1674_s27   ;;  %s1279_s26 = sphi %s1339_s26, %s1673_s26   ;;  %s1275_s25 = sphi %s1337_s25, %s1672_s25   ;;  %s1271_s24 = sphi %s1335_s24, %s1671_s24  }
   0x8   : > { %p45_p0 = scmp.ne.s32.totalorder %s1275_s25, %s1271_s24  ;;  %p1649_p1 = scmp.eq.s32.totalorder %s1356_s28, 0 }
   0x9   : > { %p201_p3 = scmp.eq.s32.totalorder %s754_s29, 1  ;;  %p755_p5 = scmp.ge.s32.totalorder %s1283_s27, 1 }
   0xa   : > { %p1365_p4 = por %p1649_p1, %p45_p0  ;;  %p208_p7 = scmp.lt.s32.totalorder %s1283_s27, 3 }
   0xb   : > { %p1370_p6 = por %p201_p3, %p45_p0  ;;  %s1285_s10 = smov [#allocation5]  }
   0xc   : > { %s1653_s30 = scalar_select %p1365_p4, 1, 0 }
   0xd   : > { %s1654_s8 = scalar_select %p1370_p6, 1, 0 }
   0xe   : > { %p1375_p8 = pnand %p755_p5, %p208_p7  ;;  %s220_s11 = sshll.u32 %s1285_s10, 4  ;;  %s1379_s11 = int_to_ptr.vmem [resolvable:$true] %s220_s11 }
   0xf   : > { %1655 = sst [smem:[#allocation15_spill]] %s1654_s8  ;;  %s1286_s13 = smov [#allocation7]  }
  0x10   : > { %s1656_s9 = scalar_select %p1375_p8, 1, 0 }
  0x11   : > { %p1021_p9 = pneg %p1375_p8  ;;  %s236_s14 = sshll.u32 %s1286_s13, 4  ;;  %s1390_s14 = int_to_ptr.vmem [resolvable:$true] %s236_s14 }
  0x12   : > { %s1287_s15 = smov [#allocation8]   ;;  %s1095_s19 = scalar_lea.hbm %s1642_s1, 2048 }
  0x13   : > { %p1386_p11 = pnand %p1021_p9, %p1649_p1  ;;  %s1392_s16 = sshll.u32 %s1287_s15, 4  ;;  %s253_s16 = int_to_ptr.vmem [resolvable:$true] %s1392_s16 }
  0x14   : > { %p1096_p12 = scmp.ne.s32.totalorder %s1642_s1, %s1095_s19  ;;  %p1102_p5 = scmp.lt.u32.totalorder %s1095_s19, %s1642_s1 }
  0x15   : > { %p1402_p13 = pneg %p1386_p11 }
  0x17   : > { %p1098_p0 = pnand %p1402_p13, %p1096_p12 }
  0x19   : > { %p1099_p3 = pneg %p1098_p0 }
  0x1b   : > { %p1104_p7 = pnand %p1102_p5, %p1099_p3 }
  0x1d   : > { %1107 = shalt.err (!%p1104_p7)
}
  0x1e   : > { %s1108_s10 = scalar_lea.vmem %s1379_s11, 2048  ;;  %p1116_p2 = scmp.lt.s32.totalorder %s1379_s11, %s1379_s11 }
  0x1f   : > { %p1109_p9 = scmp.ne.s32.totalorder %s1379_s11, %s1108_s10  ;;  %p1117_p6 = scmp.lt.s32.totalorder %s1108_s10, %s1108_s10 }
  0x21   : > { %p1111_p10 = pnand %p1109_p9, %p1402_p13  ;;  %p1118_p12 = por %p1117_p6, %p1116_p2 }
  0x23   : > { %p1112_p1 = pneg %p1111_p10 }
  0x25   : > { %p1119_p0 = pnand %p1118_p12, %p1112_p1 }
  0x27   : > { %1122 = shalt.err (!%p1119_p0)
}
  0x28   : > { %s1288_s13 = smov 128   ;;  %s1289_s15 = smov 8  }
  0x29   : > { %1024 = dma.hbm_to_vmem [thread:$0]  (!%p1386_p11), %s1642_s1, 2048, %s1379_s11, [#allocation6], %s1288_s13, %s1288_s13, %s1289_s15  }
  0x2a   : > { %s1123_s21 = scalar_lea.hbm %s1644_s3, 2048 }
  0x2b   : > { %p1124_p1 = scmp.ne.s32.totalorder %s1644_s3, %s1123_s21  ;;  %p1130_p10 = scmp.lt.u32.totalorder %s1123_s21, %s1644_s3 }
  0x2d   : > { %p1126_p2 = pnand %p1124_p1, %p1402_p13 }
  0x2f   : > { %p1127_p6 = pneg %p1126_p2 }
  0x31   : > { %p1132_p3 = pnand %p1130_p10, %p1127_p6 }
  0x33   : > { %1135 = shalt.err (!%p1132_p3)
}
  0x34   : > { %s1136_s11 = scalar_lea.vmem %s1390_s14, 2048  ;;  %p1144_p12 = scmp.lt.s32.totalorder %s1390_s14, %s1390_s14 }
  0x35   : > { %p1137_p5 = scmp.ne.s32.totalorder %s1390_s14, %s1136_s11  ;;  %p1145_p0 = scmp.lt.s32.totalorder %s1136_s11, %s1136_s11 }
  0x37   : > { %p1139_p7 = pnand %p1137_p5, %p1402_p13  ;;  %p1146_p1 = por %p1145_p0, %p1144_p12 }
  0x39   : > { %p1140_p9 = pneg %p1139_p7 }
  0x3b   : > { %p1147_p2 = pnand %p1146_p1, %p1140_p9 }
  0x3d   : > { %1150 = shalt.err (!%p1147_p2)
}
  0x3e   : > { %1027 = dma.hbm_to_vmem [thread:$0]  (!%p1386_p11), %s1644_s3, 2048, %s1390_s14, [#allocation6], %s1288_s13, %s1288_s13, %s1289_s15  }
  0x3f   : > { %s1151_s20 = scalar_lea.hbm %s1646_s5, 2048 }
  0x40   : > { %p1152_p6 = scmp.ne.s32.totalorder %s1646_s5, %s1151_s20  ;;  %p1158_p5 = scmp.lt.u32.totalorder %s1151_s20, %s1646_s5 }
  0x42   : > { %p1154_p10 = pnand %p1152_p6, %p1402_p13 }
  0x44   : > { %p1155_p3 = pneg %p1154_p10 }
  0x46   : > { %p1160_p7 = pnand %p1158_p5, %p1155_p3 }
  0x48   : > { %1163 = shalt.err (!%p1160_p7)
}
  0x49   : > { %s1164_s11 = scalar_lea.vmem %s253_s16, 2048  ;;  %p1172_p1 = scmp.lt.s32.totalorder %s253_s16, %s253_s16 }
  0x4a   : > { %p1165_p9 = scmp.ne.s32.totalorder %s253_s16, %s1164_s11  ;;  %p1173_p2 = scmp.lt.s32.totalorder %s1164_s11, %s1164_s11 }
  0x4c   : > { %p1167_p12 = pnand %p1165_p9, %p1402_p13  ;;  %p1174_p4 = por %p1173_p2, %p1172_p1 }
  0x4e   : > { %p1168_p0 = pneg %p1167_p12 }
  0x50   : > { %p1175_p8 = pnand %p1174_p4, %p1168_p0 }
  0x52   : > { %1178 = shalt.err (!%p1175_p8)
}
  0x53   : > { %1030 = dma.hbm_to_vmem [thread:$0]  (!%p1386_p11), %s1646_s5, 2048, %s253_s16, [#allocation9], %s1288_s13, %s1288_s13, %s1289_s15  }
  0x54   : > { %s1475_s22 = sadd.s32 1, %s1283_s27   ;;  %s32_s17 = sadd.s32 1, %s1279_s26 }
  0x55   : > { %s29_s12 = ssub.s32 %s1283_s27, %s1475_s22  ;;  %p39_p8 = scmp.ne.s32.totalorder %s1279_s26, %s1275_s25 }
  0x56   : > { %p30_p4 = scmp.eq.s32.totalorder %s29_s12, 0  ;;  %p40_p13 = scmp.eq.s32.totalorder %s1283_s27, 0 }
  0x57   : > { %p1042_p6 = scmp.lt.s32.totalorder %s1283_s27, 2  ;;  %p1659_p3 = scmp.eq.s32.totalorder %s1356_s28, 1 }
  0x58   : > { %s1485_s18 = scalar_select %p30_p4, %s1279_s26, %s32_s17  }
  0x59   : > { %p41_p10 = por %p40_p13, %p39_p8  ;;  %p1489_p5 = por %p1659_p3, %p39_p8 }
  0x5a   : > { %s269_s20 = sand.u32 1, %s1279_s26   ;;  %s761_s21 = sshll.u32 %s1283_s27, 7 }
  0x5b   : > { %s760_s16 = sshll.u32 %s269_s20, 3  ;;  %s1498_s23 = scalar_lea.hbm %s1641_s0, %s761_s21 }
  0x5c   : > { %s273_s29 = scalar_lea.vmem [#allocation2], %s760_s16  ;;  %p1500_p11 = pnand %p1042_p6, %p41_p10 }
  0x5d   : > { %s280_s10 = sshll.u32 %s273_s29, 4  ;;  %s270_s14 = scalar_lea.sflag [#allocation3], %s269_s20  ;;  %s1504_s10 = int_to_ptr.vmem [resolvable:$true] %s280_s10 }
  0x5e   : > { %s1179_s8 = scalar_lea.hbm %s1498_s23, 128  ;;  %p1181_p9 = pneg %p1500_p11 }
  0x5f   : > { %p1180_p7 = scmp.ne.s32.totalorder %s1498_s23, %s1179_s8  ;;  %s1184_s21 = scalar_lea.hbm %s1641_s0, 256 }
  0x60   : > { %p1185_p1 = scmp.lt.u32.totalorder %s1498_s23, %s1641_s0  ;;  %p1186_p2 = scmp.lt.u32.totalorder %s1184_s21, %s1179_s8 }
  0x61   : > { %p1182_p12 = pnand %p1181_p9, %p1180_p7  ;;  %p1188_p8 = scmp.lt.u32.totalorder %s1179_s8, %s1498_s23 }
  0x62   : > { %p1187_p4 = por %p1186_p2, %p1185_p1 }
  0x63   : > { %p1183_p0 = pneg %p1182_p12 }
  0x64   : > { %p1189_p13 = por %p1188_p8, %p1187_p4 }
  0x66   : > { %p1190_p6 = pnand %p1189_p13, %p1183_p0 }
  0x68   : > { %1193 = shalt.err (!%p1190_p6)
}
  0x69   : > { %s1194_s20 = scalar_lea.vmem %s1504_s10, 128  ;;  %s1290_s15 = smov [#allocation2]  }
  0x6a   : > { %p1195_p10 = scmp.ne.s32.totalorder %s1504_s10, %s1194_s20  ;;  %s1199_s29 = sshll.u32 %s1290_s15, 4  ;;  %s1200_s29 = int_to_ptr.vmem [resolvable:$false] %s1199_s29 }
  0x6b   : > { %s1201_s12 = scalar_lea.vmem %s1200_s29, 256  ;;  %p1202_p12 = scmp.lt.s32.totalorder %s1504_s10, %s1200_s29 }
  0x6c   : > { %p1197_p3 = pnand %p1195_p10, %p1181_p9  ;;  %p1203_p1 = scmp.lt.s32.totalorder %s1201_s12, %s1194_s20 }
  0x6e   : > { %p1198_p7 = pneg %p1197_p3  ;;  %p1204_p2 = por %p1203_p1, %p1202_p12 }
  0x70   : > { %p1205_p4 = pnand %p1204_p2, %p1198_p7 }
  0x72   : > { %1208 = shalt.err (!%p1205_p4)
}
  0x73   : > { %1034 = dma.hbm_to_vmem [thread:$0]  (!%p1500_p11), %s1498_s23, 128, %s1504_s10, %s270_s14  }
  0x74   : > { %p1662_p0 = scmp.ne.s32.totalorder %s1656_s9, 0 }
  0x75   : > { %s1534_s8 = sand.u32 (!%p1662_p0), 1, %s1275_s25   ;;  %p1663_p9 = scmp.ne.s32.totalorder (!%p1662_p0), %s1653_s30, 0 }
  0x76   : > { %289 = sbr.rel (%p1662_p0) target bundleno = 894 (0x37e), region = 48  ;;  %s763_s17 = sshll.u32 (!%p1662_p0), %s1534_s8, 3 }
  0x77   : > { %s292_s21 = scalar_lea.sflag (!%p1662_p0), [#allocation3], %s1534_s8  ;;  %s1540_s16 = scalar_lea.vmem (!%p1662_p0), [#allocation2], %s763_s17 }
  0x7d   : > { %1254 = dma.done.wait (%p1663_p9), %s292_s21, 128  }
  0x7e   : > { %1256 = vsyncadd (%p1663_p9), %s292_s21, 4294967168  ;;  %p1664_p11 = scmp.eq.s32.totalorder %s1356_s28, 0 }
  0x80   : > { %1258 = dma.done.wait (%p1664_p11), [#allocation6], 4096   ;;  %p1665_p8 = pmov %p1664_p11 }
  0x82   : > { %1260 = vsyncadd (%p1665_p8), [#allocation6], 4294963200  ;;  %p1666_p13 = pmov %p1665_p8 }
  0x83   : > { %p1667_p6 = pmov %p1665_p8 }
  0x84   : > { %1262 = dma.done.wait (%p1666_p13), [#allocation9], 2048  }
  0x85   : > { %1264 = vsyncadd (%p1667_p6), [#allocation9], 4294965248  ;;  %v1291_v0 = vmov 0.0|0.0   ;;  %vm1292_vm0 = vmmov 0   ;;  %v1293_v1 = vmov 0.0   ;;  %v339_v2 = vld [vmem:[#allocation5] sm:$0xff] }
  0x86   : > { %933 = vmatprep.subr.bf16.mxu0 %v1291_v0  ;;  %860 = vmatprep.mubr.msk.f32.mxu0 %vm1292_vm0, %v1293_v1  ;;  %v340_v3 = vld [vmem:[#allocation5 + $0x8] sm:$0xff]  ;;  %v341_v4 = vld [vmem:[#allocation5 + $0x10] sm:$0xff]  ;;  %v342_v6 = vld [vmem:[#allocation5 + $0x18] sm:$0xff]  ;;  %s774_s13 = sshll.u32 %s1356_s28, 7  ;;  %s337_s20 = scalar_lea.vmem [#allocation10], %s763_s17 }
  0x87   : > { %957 = vmatprep.subr.bf16.mxu1 %v1291_v0  ;;  %895 = vmatprep.mubr.msk.f32.mxu1 %vm1292_vm0, %v1293_v1  ;;  %v934_v5 = vpack.c.bf16 %v340_v3, %v339_v2  ;;  %v937_v7 = vpack.c.bf16 %v342_v6, %v341_v4  ;;  %v343_v8 = vld [vmem:[#allocation5 + $0x20] sm:$0xff]  ;;  %v344_v9 = vld [vmem:[#allocation5 + $0x28] sm:$0xff]  ;;  %v345_v11 = vld [vmem:[#allocation5 + $0x30] sm:$0xff]  ;;  %s655_s15 = sshll.u32 %s337_s20, 4  ;;  %s1597_s21 = scalar_lea.hbm %s1648_s7, %s774_s13  ;;  %s1599_s15 = int_to_ptr.vmem [resolvable:$true] %s655_s15 }
  0x88   : > { %v940_v10 = vpack.c.bf16 %v344_v9, %v343_v8  ;;  %v346_v12 = vld [vmem:[#allocation5 + $0x38] sm:$0xff]  ;;  %v347_v14 = vld [vmem:[#allocation5 + $0x40] sm:$0xff]  ;;  %v348_v15 = vld [vmem:[#allocation5 + $0x48] sm:$0xff]  ;;  %s1209_s30 = scalar_lea.vmem %s1599_s15, 128  ;;  %s1294_s28 = smov [#allocation10]  }
  0x89   : > { %935 = vmatpush3.bf16.msra.mxu0 %v934_v5  ;;  %v943_v13 = vpack.c.bf16 %v346_v12, %v345_v11  ;;  %v946_v16 = vpack.c.bf16 %v348_v15, %v347_v14  ;;  %v349_v17 = vld [vmem:[#allocation5 + $0x50] sm:$0xff]  ;;  %v350_v18 = vld [vmem:[#allocation5 + $0x58] sm:$0xff]  ;;  %v351_v20 = vld [vmem:[#allocation5 + $0x60] sm:$0xff]  ;;  %p1210_p10 = scmp.ne.s32.totalorder %s1599_s15, %s1209_s30  ;;  %s1213_s17 = sshll.u32 %s1294_s28, 4  ;;  %s1214_s17 = int_to_ptr.vmem [resolvable:$false] %s1213_s17 }
  0x8a   : > { %936 = vmatprep.subr.bf16.mxu0 %v1291_v0  ;;  %v949_v19 = vpack.c.bf16 %v350_v18, %v349_v17  ;;  %v352_v21 = vld [vmem:[#allocation5 + $0x68] sm:$0xff]  ;;  %v353_v23 = vld [vmem:[#allocation5 + $0x70] sm:$0xff]  ;;  %v354_v24 = vld [vmem:[#allocation5 + $0x78] sm:$0xff]  ;;  %s1215_s9 = scalar_lea.vmem %s1214_s17, 256  ;;  %p1216_p12 = scmp.lt.s32.totalorder %s1599_s15, %s1214_s17 }
  0x8b   : > { %v952_v22 = vpack.c.bf16 %v352_v21, %v351_v20  ;;  %v955_v25 = vpack.c.bf16 %v354_v24, %v353_v23  ;;  %v338_v26 = vld [vmem:[%s1540_s16] sm:$0xff]  ;;  %v443_v27 = vld [vmem:[#allocation7] sm:$0xff]  ;;  %v444_v28 = vld [vmem:[#allocation7 + $0x8] sm:$0xff]  ;;  %s642_s16 = scalar_lea.sflag [#allocation4], %s1534_s8  ;;  %p1211_p3 = pnand %p1210_p10, %p1489_p5 }
  0x8c   : > { %v958_v29 = vpack.c.bf16 %v444_v28, %v443_v27  ;;  %v445_v30 = vld [vmem:[#allocation7 + $0x10] sm:$0xff]  ;;  %v446_v31 = vld [vmem:[#allocation7 + $0x18] sm:$0xff]  ;;  %v447_v33 = vld [vmem:[#allocation7 + $0x20] sm:$0xff]  ;;  %p1217_p1 = scmp.lt.s32.totalorder %s1215_s9, %s1209_s30 }
  0x8d   : > { %938 = vmatpush3.bf16.msra.mxu0 %v937_v7  ;;  %v961_v32 = vpack.c.bf16 %v446_v31, %v445_v30  ;;  %v448_v34 = vld [vmem:[#allocation7 + $0x28] sm:$0xff]  ;;  %v449_v36 = vld [vmem:[#allocation7 + $0x30] sm:$0xff]  ;;  %v450_v37 = vld [vmem:[#allocation7 + $0x38] sm:$0xff]  ;;  %p1212_p7 = pneg %p1211_p3 }
  0x8e   : > { %939 = vmatprep.subr.bf16.mxu0 %v1291_v0  ;;  %959 = vmatpush3.bf16.msra.mxu1 %v958_v29  ;;  %v964_v35 = vpack.c.bf16 %v448_v34, %v447_v33  ;;  %v451_v38 = vld [vmem:[#allocation7 + $0x40] sm:$0xff]  ;;  %v967_v39 = vpack.c.bf16 %v450_v37, %v449_v36  ;;  %v452_v40 = vld [vmem:[#allocation7 + $0x48] sm:$0xff]  ;;  %v453_v42 = vld [vmem:[#allocation7 + $0x50] sm:$0xff]  ;;  %p1218_p2 = por %p1217_p1, %p1216_p12 }
  0x8f   : > { %960 = vmatprep.subr.bf16.mxu1 %v1291_v0  ;;  %v970_v41 = vpack.c.bf16 %v452_v40, %v451_v38  ;;  %v454_v43 = vld [vmem:[#allocation7 + $0x58] sm:$0xff]  ;;  %v455_v45 = vld [vmem:[#allocation7 + $0x60] sm:$0xff]  ;;  %v456_v46 = vld [vmem:[#allocation7 + $0x68] sm:$0xff] }
  0x90   : > { %v973_v44 = vpack.c.bf16 %v454_v43, %v453_v42  ;;  %v976_v47 = vpack.c.bf16 %v456_v46, %v455_v45  ;;  %v457_v48 = vld [vmem:[#allocation7 + $0x70] sm:$0xff]  ;;  %v458_v49 = vld [vmem:[#allocation7 + $0x78] sm:$0xff]  ;;  %v547_v2 = vld [vmem:[#allocation8] sm:$0xff]  ;;  %p1219_p4 = pnand %p1218_p2, %p1212_p7 }
  0x91   : > { %941 = vmatpush3.bf16.msra.mxu0 %v940_v10  ;;  %v979_v50 = vpack.c.bf16 %v458_v49, %v457_v48  ;;  %v768_v51 = vld [vmem:[%s1643_s2] ss:$0 sm:$0xff]  ;;  %v548_v3 = vld [vmem:[#allocation8 + $0x8] sm:$0xff]  ;;  %v550_v6 = vld [vmem:[#allocation8 + $0x18] sm:$0xff] }
  0x92   : > { %942 = vmatprep.subr.bf16.mxu0 %v1291_v0  ;;  %962 = vmatpush3.bf16.msra.mxu1 %v961_v32  ;;  %v982_v4 = vpack.c.bf16 %v548_v3, %v547_v2  ;;  %v549_v5 = vld [vmem:[#allocation8 + $0x10] sm:$0xff]  ;;  %v551_v8 = vld [vmem:[#allocation8 + $0x20] sm:$0xff]  ;;  %v552_v9 = vld [vmem:[#allocation8 + $0x28] sm:$0xff] }
  0x93   : > { %963 = vmatprep.subr.bf16.mxu1 %v1291_v0  ;;  %v985_v7 = vpack.c.bf16 %v550_v6, %v549_v5  ;;  %v988_v10 = vpack.c.bf16 %v552_v9, %v551_v8  ;;  %v553_v11 = vld [vmem:[#allocation8 + $0x30] sm:$0xff]  ;;  %v554_v12 = vld [vmem:[#allocation8 + $0x38] sm:$0xff]  ;;  %v555_v14 = vld [vmem:[#allocation8 + $0x40] sm:$0xff] }
  0x94   : > { %v556_v15 = vld [vmem:[#allocation8 + $0x48] sm:$0xff]  ;;  %v557_v17 = vld [vmem:[#allocation8 + $0x50] sm:$0xff]  ;;  %v558_v18 = vld [vmem:[#allocation8 + $0x58] sm:$0xff] }
  0x95   : > { %944 = vmatpush3.bf16.msra.mxu0 %v943_v13  ;;  %v991_v13 = vpack.c.bf16 %v554_v12, %v553_v11  ;;  %v559_v20 = vld [vmem:[#allocation8 + $0x60] sm:$0xff]  ;;  %v560_v21 = vld [vmem:[#allocation8 + $0x68] sm:$0xff]  ;;  %v561_v23 = vld [vmem:[#allocation8 + $0x70] sm:$0xff] }
  0x96   : > { %945 = vmatprep.subr.bf16.mxu0 %v1291_v0  ;;  %965 = vmatpush3.bf16.msra.mxu1 %v964_v35  ;;  %v562_v24 = vld [vmem:[#allocation8 + $0x78] sm:$0xff] }
  0x97   : > { %966 = vmatprep.subr.bf16.mxu1 %v1291_v0 }
  0x99   : > { %947 = vmatpush3.bf16.msra.mxu0 %v946_v16  ;;  %v994_v16 = vpack.c.bf16 %v556_v15, %v555_v14 }
  0x9a   : > { %948 = vmatprep.subr.bf16.mxu0 %v1291_v0  ;;  %968 = vmatpush3.bf16.msra.mxu1 %v967_v39  ;;  %v772_v39 = vld [vmem:[%s1647_s6] ss:$0 sm:$0xff] }
  0x9b   : > { %969 = vmatprep.subr.bf16.mxu1 %v1291_v0 }
  0x9d   : > { %950 = vmatpush3.bf16.msra.mxu0 %v949_v19  ;;  %v997_v19 = vpack.c.bf16 %v558_v18, %v557_v17 }
  0x9e   : > { %951 = vmatprep.subr.bf16.mxu0 %v1291_v0  ;;  %971 = vmatpush3.bf16.msra.mxu1 %v970_v41 }
  0x9f   : > { %972 = vmatprep.subr.bf16.mxu1 %v1291_v0 }
  0xa1   : > { %953 = vmatpush3.bf16.msra.mxu0 %v952_v22  ;;  %v1000_v22 = vpack.c.bf16 %v560_v21, %v559_v20 }
  0xa2   : > { %954 = vmatprep.subr.bf16.mxu0 %v1291_v0  ;;  %974 = vmatpush3.bf16.msra.mxu1 %v973_v44 }
  0xa3   : > { %975 = vmatprep.subr.bf16.mxu1 %v1291_v0 }
  0xa5   : > { %956 = vmatpush3.bf16.msra.mxu0 %v955_v25  ;;  %v1003_v25 = vpack.c.bf16 %v562_v24, %v561_v23 }
  0xa6   : > { %981 = vmatprep.subr.bf16.mxu0 %v1291_v0  ;;  %977 = vmatpush3.bf16.msra.mxu1 %v976_v47 }
  0xa7   : > { %978 = vmatprep.subr.bf16.mxu1 %v1291_v0 }
  0xa8   : > { %861 = vmatmul.mubr.f32.vlgmr.msra.gmra.mrb[0].mxu0 %v338_v26  ;;  %v770_v26 = vld [vmem:[%s1645_s4] ss:$0 sm:$0xff] }
  0xa9   : > { %930 = vmatprep.mubr.msk.f32.mxu0 %vm1292_vm0, %v1293_v1  ;;  %983 = vmatpush3.bf16.msra.mxu0 %v982_v4 }
  0xaa   : > { %980 = vmatpush3.bf16.msra.mxu1 %v979_v50  ;;  %984 = vmatprep.subr.bf16.mxu0 %v1291_v0 }
  0xad   : > { %986 = vmatpush3.bf16.msra.mxu0 %v985_v7 }
  0xae   : > { %987 = vmatprep.subr.bf16.mxu0 %v1291_v0 }
  0xb1   : > { %989 = vmatpush3.bf16.msra.mxu0 %v988_v10 }
  0xb2   : > { %990 = vmatprep.subr.bf16.mxu0 %v1291_v0 }
  0xb5   : > { %992 = vmatpush3.bf16.msra.mxu0 %v991_v13 }
  0xb6   : > { %993 = vmatprep.subr.bf16.mxu0 %v1291_v0 }
  0xb9   : > { %995 = vmatpush3.bf16.msra.mxu0 %v994_v16 }
  0xba   : > { %996 = vmatprep.subr.bf16.mxu0 %v1291_v0 }
  0xbd   : > { %998 = vmatpush3.bf16.msra.mxu0 %v997_v19 }
  0xbe   : > { %999 = vmatprep.subr.bf16.mxu0 %v1291_v0 }
  0xc1   : > { %1001 = vmatpush3.bf16.msra.mxu0 %v1000_v22 }
  0xc2   : > { %1002 = vmatprep.subr.bf16.mxu0 %v1291_v0 }
  0xc5   : > { %1004 = vmatpush3.bf16.msra.mxu0 %v1003_v25 }
 0x17b   : > { %v428_v52 = vpop.f32.mrb[0].mxu0 }
 0x17c   : > { %v429_v53 = vadd.f32 %v768_v51, %v428_v52  ;;  %v862_v54 = vpop.f32.mrb[1].mxu0 }
 0x17e   : > { %v432_v55 = vmul.f32 1.442695, %v429_v53  ;;  %vm440_vm1 = vcmp.gt.f32.partialorder %v429_v53, 20.0 }
 0x180   : > { %1087 = vpow2.f32 %v432_v55 }
 0x18a   : > { %v1088_v56 = vpop.eup %1087 }
 0x18b   : > { %v434_v57 = vadd.f32 1.0, %v1088_v56 }
 0x18d   : > { %v435_v58 = vmul.f32 %v434_v57, %v434_v57 }
 0x18f   : > { %v437_v59 = vadd.f32 1.0, %v435_v58  ;;  %v769_v60 = vadd.f32 -1.0, %v435_v58 }
 0x191   : > { %1089 = vrcp.f32 %v437_v59 }
 0x19b   : > { %v1090_v61 = vpop.eup %1089 }
 0x19c   : > { %v439_v62 = vmul.f32 %v1090_v61, %v769_v60 }
 0x19e   : > { %v441_v63 = vmul.f32 %v439_v62, %v429_v53 }
 0x1a0   : > { %v442_v1 = vsel %vm440_vm1, %v429_v53, %v441_v63 }
 0x1a1   : > { %896 = vmatmul.mubr.f32.vlgmr.msra.gmra.mrb[0].mxu1 %v442_v1 }
 0x274   : > { %v532_v27 = vpop.f32.mrb[0].mxu1 }
 0x275   : > { %v533_v28 = vadd.f32 %v770_v26, %v532_v27  ;;  %v897_v29 = vpop.f32.mrb[1].mxu1 }
 0x277   : > { %v536_v30 = vmul.f32 1.442695, %v533_v28  ;;  %vm544_vm2 = vcmp.gt.f32.partialorder %v533_v28, 20.0 }
 0x279   : > { %1091 = vpow2.f32 %v536_v30 }
 0x283   : > { %v1092_v31 = vpop.eup %1091 }
 0x284   : > { %v538_v32 = vadd.f32 1.0, %v1092_v31 }
 0x286   : > { %v539_v33 = vmul.f32 %v538_v32, %v538_v32 }
 0x288   : > { %v541_v34 = vadd.f32 1.0, %v539_v33  ;;  %v771_v35 = vadd.f32 -1.0, %v539_v33 }
 0x28a   : > { %1093 = vrcp.f32 %v541_v34 }
 0x294   : > { %v1094_v36 = vpop.eup %1093 }
 0x295   : > { %v543_v0 = vmul.f32 %v1094_v36, %v771_v35 }
 0x297   : > { %v545_v37 = vmul.f32 %v543_v0, %v533_v28 }
 0x299   : > { %v546_v38 = vsel %vm544_vm2, %v533_v28, %v545_v37 }
 0x29a   : > { %931 = vmatmul.mubr.f32.vlgmr.msra.gmra.mrb[2].mxu0 %v546_v38 }
 0x36d   : > { %v636_v40 = vpop.f32.mrb[2].mxu0 }
 0x36e   : > { %v637_v41 = vadd.f32 %v772_v39, %v636_v40  ;;  %v932_v42 = vpop.f32.mrb[3].mxu0 }
 0x370   : > { %640 = vst [vmem:[%s337_s20] sm:$0xff] %v637_v41 }
 0x371   : > { %1222 = shalt.err (!%p1219_p4)
}
 0x372   : > { %s1223_s8 = scalar_lea.hbm %s1597_s21, 128  ;;  %s1227_s11 = scalar_lea.hbm %s1648_s7, 256 }
 0x373   : > { %p1224_p0 = scmp.ne.s32.totalorder %s1597_s21, %s1223_s8  ;;  %p1228_p8 = scmp.lt.u32.totalorder %s1597_s21, %s1648_s7 }
 0x374   : > { %p1229_p13 = scmp.lt.u32.totalorder %s1227_s11, %s1223_s8  ;;  %p1231_p10 = scmp.lt.u32.totalorder %s1223_s8, %s1597_s21 }
 0x375   : > { %p1225_p9 = pnand %p1224_p0, %p1489_p5 }
 0x376   : > { %p1230_p6 = por %p1229_p13, %p1228_p8 }
 0x377   : > { %p1226_p11 = pneg %p1225_p9 }
 0x378   : > { %p1232_p3 = por %p1231_p10, %p1230_p6 }
 0x37a   : > { %p1233_p7 = pnand %p1232_p3, %p1226_p11 }
 0x37c   : > { %1236 = shalt.err (!%p1233_p7)
}
 0x37d   : > { %1019 = dma.vmem_to_hbm [thread:$0]  (%p1489_p5), %s1599_s15, 128, %s1597_s21, %s642_s16  }
 0x37e PF: > { %s1668_s20 = sld [smem:[#allocation15_spill]]  ;;  %s667_s29 = sand.u32 1, %s1271_s24  }
 0x37f   : > { %p1670_p1 = scmp.ge.s32.totalorder %s1283_s27, 2  ;;  %s668_s12 = scalar_lea.sflag [#allocation4], %s667_s29 }
 0x384   : > { %p1669_p12 = scmp.ne.s32.totalorder %s1668_s20, 0 }
 0x386   : > { %p1036_p2 = pnand %p1670_p1, %p1669_p12 }
 0x388   : > { %1266 = dma.done.wait (!%p1036_p2), %s668_s12, 128  }
 0x389   : > { %1268 = vsyncadd (!%p1036_p2), %s668_s12, 4294967168  ;;  %p22_p4 = scmp.ge.s32.totalorder %s1475_s22, 4   ;;  %s1671_s24 = smov %s1275_s25 }
 0x38a   : > { %s1672_s25 = smov %s1279_s26  ;;  %s1673_s26 = smov %s1485_s18 }
 0x38b   : > { %s1674_s27 = smov %s1475_s22  ;;  %24 = sbr.rel (!%p22_p4) target bundleno = 7 (0x7), region = 105 }
 0x392   :  { %673 = vsyncpa [#allocation3], 1 }
 0x393   :  { %675 = vsyncpa [#allocation3 + $0x1], 1 }
 0x394   :  { %676 = vsyncpa [#allocation6], 1 }
 0x395   :  { %677 = vsyncpa [#allocation9], 1 }
 0x396   :  { %678 = vsyncpa [#allocation4], 1 }
 0x397   :  { %680 = vsyncpa [#allocation4 + $0x1], 1 }

</bundles_post_ra>
